<compile_context>
chip_gen: v6e
topology: v6e:2x2x1
jax: 0.10.0
libtpu: 0.0.40
codegen_flags: <defaults>
</compile_context>

<pallas_src>
import jax
import jax.numpy as jnp
from jax.experimental import pallas as pl
from jax.experimental.pallas import tpu as pltpu


def _make_center_crop_kernel(W, top, left, crop_h, crop_w):
    """Kernel factory: crop window constants are baked in (all slices static)."""

    def kernel(g_ref, o_ref):
        # g_ref: (TN, H*W) flattened gray frames (lane-dense).
        # o_ref: (TN, crop_h*crop_w) flattened cropped frames (lane-dense).
        for h in range(crop_h):                       # short static loop, unrolled
            src = (top + h) * W + left
            o_ref[:, h * crop_w:(h + 1) * crop_w] = g_ref[:, src:src + crop_w]

    return kernel


def gray_crop_flip(x, length=None, *, channel_input='bgr', size=(12, 12),
                   skip_gray=False):
    """Forward pass of GrayCropFlip in eval mode (grayscale + CenterCrop).

    x: (B, T, H, W, 3) channels-last video, same as the PyTorch module.
    Returns ((B, T, crop_h, crop_w), length).
    """
    assert not skip_gray, "skip_gray=True path not implemented"
    assert x.shape[-1] == 3, f"input must have r,g,b 3 channels, got {x.shape}"
    B, T, H, W, C = x.shape
    c2i = {channel_input[i]: i for i in range(len(channel_input))}
    N = B * T

    # ---- grayscale: single fused, coalesced XLA elementwise pass (no transpose).
    gray = (0.114 * x[..., c2i['b']]
            + 0.587 * x[..., c2i['g']]
            + 0.299 * x[..., c2i['r']])                       # (B, T, H, W)

    if size is None:
        # Module with size=None only does the grayscale step.
        return gray, length

    crop_h, crop_w = size
    assert crop_h <= H and crop_w <= W, (
        f"crop {size} larger than frame {(H, W)} (padding not supported)")
    # torchvision CenterCrop offsets
    top = int(round((H - crop_h) / 2.0))
    left = int(round((W - crop_w) / 2.0))

    gray_flat = gray.reshape(N, H * W)                        # free (contiguous)

    # ---- batched crop kernel: TN frames per grid step, ~4 MiB input block.
    lane_padded = ((H * W + 127) // 128) * 128                # VMEM lane padding
    bytes_per_frame = lane_padded * jnp.dtype(gray_flat.dtype).itemsize
    tn_cap = max(1, (4 * 1024 * 1024) // bytes_per_frame)
    if tn_cap >= N:
        TN = N                                                # single/exact block
    else:
        TN = max(8, (tn_cap // 8) * 8)                        # keep sublane-friendly

    kernel = _make_center_crop_kernel(W, top, left, crop_h, crop_w)

    out = pl.pallas_call(
        kernel,
        out_shape=jax.ShapeDtypeStruct((N, crop_h * crop_w), gray_flat.dtype),
        grid=(pl.cdiv(N, TN),),
        in_specs=[pl.BlockSpec((TN, H * W), lambda n: (n, 0))],
        out_specs=pl.BlockSpec((TN, crop_h * crop_w), lambda n: (n, 0)),
        compiler_params=pltpu.CompilerParams(
            dimension_semantics=("parallel",)),
    )(gray_flat)

    return out.reshape(B, T, crop_h, crop_w), length


def _reference(x, channel_input='bgr', size=(12, 12)):
    c2i = {channel_input[i]: i for i in range(len(channel_input))}
    gray = (0.114 * x[..., c2i['b']]
            + 0.587 * x[..., c2i['g']]
            + 0.299 * x[..., c2i['r']])
    H, W = gray.shape[-2:]
    ch, cw = size
    top = int(round((H - ch) / 2.0))
    left = int(round((W - cw) / 2.0))
    return gray[..., top:top + ch, left:left + cw]


if __name__ == "__main__":
    key = jax.random.PRNGKey(0)
    B, T, H, W = 2, 4, 16, 16
    size = (12, 12)
    x = jax.random.uniform(key, (B, T, H, W, 3), dtype=jnp.float32)
    length = jnp.full((B,), T, dtype=jnp.int32)

    out, out_len = gray_crop_flip(x, length, channel_input='bgr', size=size)
    out = jax.block_until_ready(out)

    ref = _reference(x, channel_input='bgr', size=size)
    assert out.shape == (B, T, size[0], size[1]), out.shape
    assert jnp.allclose(out, ref, atol=1e-5, rtol=1e-5), "mismatch vs reference"
    assert out_len is length

    print("KERNEL_OK")
</pallas_src>

<mosaic_0001>
module attributes {stable_mosaic.version = 11 : i64} {
  func.func @kernel(%arg0: i32, %arg1: memref<8x256xf32, #tpu.memory_space<vmem>>, %arg2: memref<8x144xf32, #tpu.memory_space<vmem>>) attributes {dimension_semantics = [#tpu.dimension_semantics<parallel>], iteration_bounds = array<i64: 1>, scalar_prefetch = 0 : i64, scratch_operands = 0 : i64, tpu.core_type = #tpu.core_type<tc>, window_params = [{transform_indices = @transform_0, window_bounds = array<i64: 8, 256>}, {transform_indices = @transform_1, window_bounds = array<i64: 8, 144>}]} {
    %c0 = arith.constant 0 : index
    %c34 = arith.constant 34 : index
    %0 = vector.load %arg1[%c0, %c34] : memref<8x256xf32, #tpu.memory_space<vmem>>, vector<8x12xf32>
    %c0_0 = arith.constant 0 : index
    %c0_1 = arith.constant 0 : index
    %1 = vector.load %arg2[%c0_0, %c0_1] : memref<8x144xf32, #tpu.memory_space<vmem>>, vector<8x12xf32>
    tpu.vector_store %arg2[%c0_0, %c0_1], %0 {strides = array<i32>} : memref<8x144xf32, #tpu.memory_space<vmem>>, vector<8x12xf32>,
    %c0_2 = arith.constant 0 : index
    %c50 = arith.constant 50 : index
    %2 = vector.load %arg1[%c0_2, %c50] : memref<8x256xf32, #tpu.memory_space<vmem>>, vector<8x12xf32>
    %c0_3 = arith.constant 0 : index
    %c12 = arith.constant 12 : index
    %3 = vector.load %arg2[%c0_3, %c12] : memref<8x144xf32, #tpu.memory_space<vmem>>, vector<8x12xf32>
    tpu.vector_store %arg2[%c0_3, %c12], %2 {strides = array<i32>} : memref<8x144xf32, #tpu.memory_space<vmem>>, vector<8x12xf32>,
    %c0_4 = arith.constant 0 : index
    %c66 = arith.constant 66 : index
    %4 = vector.load %arg1[%c0_4, %c66] : memref<8x256xf32, #tpu.memory_space<vmem>>, vector<8x12xf32>
    %c0_5 = arith.constant 0 : index
    %c24 = arith.constant 24 : index
    %5 = vector.load %arg2[%c0_5, %c24] : memref<8x144xf32, #tpu.memory_space<vmem>>, vector<8x12xf32>
    tpu.vector_store %arg2[%c0_5, %c24], %4 {strides = array<i32>} : memref<8x144xf32, #tpu.memory_space<vmem>>, vector<8x12xf32>,
    %c0_6 = arith.constant 0 : index
    %c82 = arith.constant 82 : index
    %6 = vector.load %arg1[%c0_6, %c82] : memref<8x256xf32, #tpu.memory_space<vmem>>, vector<8x12xf32>
    %c0_7 = arith.constant 0 : index
    %c36 = arith.constant 36 : index
    %7 = vector.load %arg2[%c0_7, %c36] : memref<8x144xf32, #tpu.memory_space<vmem>>, vector<8x12xf32>
    tpu.vector_store %arg2[%c0_7, %c36], %6 {strides = array<i32>} : memref<8x144xf32, #tpu.memory_space<vmem>>, vector<8x12xf32>,
    %c0_8 = arith.constant 0 : index
    %c98 = arith.constant 98 : index
    %8 = vector.load %arg1[%c0_8, %c98] : memref<8x256xf32, #tpu.memory_space<vmem>>, vector<8x12xf32>
    %c0_9 = arith.constant 0 : index
    %c48 = arith.constant 48 : index
    %9 = vector.load %arg2[%c0_9, %c48] : memref<8x144xf32, #tpu.memory_space<vmem>>, vector<8x12xf32>
    tpu.vector_store %arg2[%c0_9, %c48], %8 {strides = array<i32>} : memref<8x144xf32, #tpu.memory_space<vmem>>, vector<8x12xf32>,
    %c0_10 = arith.constant 0 : index
    %c114 = arith.constant 114 : index
    %10 = vector.load %arg1[%c0_10, %c114] : memref<8x256xf32, #tpu.memory_space<vmem>>, vector<8x12xf32>
    %c0_11 = arith.constant 0 : index
    %c60 = arith.constant 60 : index
    %11 = vector.load %arg2[%c0_11, %c60] : memref<8x144xf32, #tpu.memory_space<vmem>>, vector<8x12xf32>
    tpu.vector_store %arg2[%c0_11, %c60], %10 {strides = array<i32>} : memref<8x144xf32, #tpu.memory_space<vmem>>, vector<8x12xf32>,
    %c0_12 = arith.constant 0 : index
    %c130 = arith.constant 130 : index
    %12 = vector.load %arg1[%c0_12, %c130] : memref<8x256xf32, #tpu.memory_space<vmem>>, vector<8x12xf32>
    %c0_13 = arith.constant 0 : index
    %c72 = arith.constant 72 : index
    %13 = vector.load %arg2[%c0_13, %c72] : memref<8x144xf32, #tpu.memory_space<vmem>>, vector<8x12xf32>
    tpu.vector_store %arg2[%c0_13, %c72], %12 {strides = array<i32>} : memref<8x144xf32, #tpu.memory_space<vmem>>, vector<8x12xf32>,
    %c0_14 = arith.constant 0 : index
    %c146 = arith.constant 146 : index
    %14 = vector.load %arg1[%c0_14, %c146] : memref<8x256xf32, #tpu.memory_space<vmem>>, vector<8x12xf32>
    %c0_15 = arith.constant 0 : index
    %c84 = arith.constant 84 : index
    %15 = vector.load %arg2[%c0_15, %c84] : memref<8x144xf32, #tpu.memory_space<vmem>>, vector<8x12xf32>
    tpu.vector_store %arg2[%c0_15, %c84], %14 {strides = array<i32>} : memref<8x144xf32, #tpu.memory_space<vmem>>, vector<8x12xf32>,
    %c0_16 = arith.constant 0 : index
    %c162 = arith.constant 162 : index
    %16 = vector.load %arg1[%c0_16, %c162] : memref<8x256xf32, #tpu.memory_space<vmem>>, vector<8x12xf32>
    %c0_17 = arith.constant 0 : index
    %c96 = arith.constant 96 : index
    %17 = vector.load %arg2[%c0_17, %c96] : memref<8x144xf32, #tpu.memory_space<vmem>>, vector<8x12xf32>
    tpu.vector_store %arg2[%c0_17, %c96], %16 {strides = array<i32>} : memref<8x144xf32, #tpu.memory_space<vmem>>, vector<8x12xf32>,
    %c0_18 = arith.constant 0 : index
    %c178 = arith.constant 178 : index
    %18 = vector.load %arg1[%c0_18, %c178] : memref<8x256xf32, #tpu.memory_space<vmem>>, vector<8x12xf32>
    %c0_19 = arith.constant 0 : index
    %c108 = arith.constant 108 : index
    %19 = vector.load %arg2[%c0_19, %c108] : memref<8x144xf32, #tpu.memory_space<vmem>>, vector<8x12xf32>
    tpu.vector_store %arg2[%c0_19, %c108], %18 {strides = array<i32>} : memref<8x144xf32, #tpu.memory_space<vmem>>, vector<8x12xf32>,
    %c0_20 = arith.constant 0 : index
    %c194 = arith.constant 194 : index
    %20 = vector.load %arg1[%c0_20, %c194] : memref<8x256xf32, #tpu.memory_space<vmem>>, vector<8x12xf32>
    %c0_21 = arith.constant 0 : index
    %c120 = arith.constant 120 : index
    %21 = vector.load %arg2[%c0_21, %c120] : memref<8x144xf32, #tpu.memory_space<vmem>>, vector<8x12xf32>
    tpu.vector_store %arg2[%c0_21, %c120], %20 {strides = array<i32>} : memref<8x144xf32, #tpu.memory_space<vmem>>, vector<8x12xf32>,
    %c0_22 = arith.constant 0 : index
    %c210 = arith.constant 210 : index
    %22 = vector.load %arg1[%c0_22, %c210] : memref<8x256xf32, #tpu.memory_space<vmem>>, vector<8x12xf32>
    %c0_23 = arith.constant 0 : index
    %c132 = arith.constant 132 : index
    %23 = vector.load %arg2[%c0_23, %c132] : memref<8x144xf32, #tpu.memory_space<vmem>>, vector<8x12xf32>
    tpu.vector_store %arg2[%c0_23, %c132], %22 {strides = array<i32>} : memref<8x144xf32, #tpu.memory_space<vmem>>, vector<8x12xf32>,
    return
  }
  func.func @transform_0(%arg0: i32) -> (i32, i32) {
    %c0_i32 = arith.constant 0 : i32
    %c0_i32_0 = arith.constant 0 : i32
    return %arg0, %c0_i32 : i32, i32
  }
  func.func @transform_1(%arg0: i32) -> (i32, i32) {
    %c0_i32 = arith.constant 0 : i32
    %c0_i32_0 = arith.constant 0 : i32
    return %arg0, %c0_i32 : i32, i32
  }
}

</mosaic_0001>

<bundles_post_ra>
// kernel: tpu_custom_call.1
= control target key start
LH: loop header
LB: loop body
LE: loop exit
PB: predicated region body
PF: predicated region fallthrough
CT: control target
= control target key end

     0   :  { %6 = vsyncpa [#allocation3], 0  ;;  %s210_s0 = inlined_call_operand.hbm [shape: f32[8,256], index: 0, kind: input, shape index: {}]   ;;  %s211_s1 = inlined_call_operand.hbm [shape: f32[8,144], index: 1, kind: output, shape index: {}]  }
   0x1   :  { %7 = vsyncpa [#allocation4], 0  ;;  %s180_s6 = smov [#allocation2]  }
   0x2   :  { %s14_s7 = sshll.u32 %s180_s6, 4  ;;  %s15_s7 = int_to_ptr.vmem [resolvable:$true] %s14_s7 }
   0x3   :  { %s144_s8 = scalar_lea.vmem %s15_s7, 256  ;;  %p149_p1 = scmp.lt.s32.totalorder %s15_s7, %s15_s7 }
   0x4   :  { %p145_p0 = scmp.ne.s32.totalorder %s15_s7, %s144_s8  ;;  %p150_p2 = scmp.lt.s32.totalorder %s144_s8, %s144_s8 }
   0x6   :  { %p151_p3 = por %p150_p2, %p149_p1 }
   0x8   :  { %p152_p4 = pnand %p151_p3, %p145_p0 }
   0xa   :  { %155 = shalt.err (!%p152_p4)
}
   0xb   :  { %17 = dma.hbm_to_vmem [thread:$0]  %s210_s0, 256, %s15_s7, [#allocation3]  }
   0xc   :  { %176 = dma.done.wait [#allocation3], 256  }
   0xd   :  { %177 = vsyncadd [#allocation3], 4294967040  ;;  %v21_v0 = vld [vmem:[#allocation2] sm:$0xff]  ;;  %s181_s11 = smov 94   ;;  %s182_s12 = smov 86   ;;  %v63_v1 = vld [vmem:[#allocation2 + $0x8] sm:$0xff] }
   0xe   :  { %23 = vrot.lane.b32.xlu0 %v21_v0, %s181_s11  ;;  %37 = vrot.lane.b32.xlu1 %v21_v0, %s182_s12  ;;  %s183_s13 = smov 90   ;;  %s184_s14 = smov 82   ;;  %vm26_vm0 = vcmask 97280   ;;  %vm33_vm1 = vcmask 195680   ;;  %vm40_vm2 = vcmask 294080   ;;  %vm47_vm3 = vcmask 392480  }
   0xf   :  { %s185_s15 = smov 78   ;;  %s186_s16 = smov 74   ;;  %vm54_vm4 = vcmask 490880   ;;  %vm61_vm5 = vcmask 589280   ;;  %vm68_vm6 = vcmask 687680   ;;  %vm75_vm7 = vcmask 786080  }
  0x10   :  { %s187_s17 = smov 70   ;;  %s188_s18 = smov 66   ;;  %vm82_vm8 = vcmask 884480   ;;  %vm89_vm9 = vcmask 982880   ;;  %vm98_vm10 = vcmask 31744   ;;  %vm96_vm11 = vcmask 1048512  }
  0x11   :  { %s189_s0 = smov 62   ;;  %s190_s19 = smov 58   ;;  %vm105_vm12 = vcmask 130080  }
  0x12   :  { %30 = vrot.lane.b32.xlu0 %v21_v0, %s183_s13  ;;  %44 = vrot.lane.b32.xlu1 %v21_v0, %s184_s14  ;;  %s191_s20 = smov 54   ;;  %s192_s21 = smov 50  }
  0x13   :  { %s193_s22 = smov [#allocation5]  }
  0x14   :  { %s113_s23 = sshll.u32 %s193_s22, 4  ;;  %s114_s23 = int_to_ptr.vmem [resolvable:$true] %s113_s23 }
  0x15   :  { %s156_s24 = scalar_lea.vmem %s114_s23, 256  ;;  %p161_p6 = scmp.lt.s32.totalorder %s114_s23, %s114_s23 }
  0x16   :  { %51 = vrot.lane.b32.xlu0 %v21_v0, %s185_s15  ;;  %58 = vrot.lane.b32.xlu1 %v21_v0, %s186_s16  ;;  %p157_p5 = scmp.ne.s32.totalorder %s114_s23, %s156_s24  ;;  %p162_p7 = scmp.lt.s32.totalorder %s156_s24, %s156_s24 }
  0x18   :  { %p163_p8 = por %p162_p7, %p161_p6 }
  0x1a   :  { %65 = vrot.lane.b32.xlu0 %v63_v1, %s187_s17  ;;  %72 = vrot.lane.b32.xlu1 %v63_v1, %s188_s18  ;;  %p164_p9 = pnand %p163_p8, %p157_p5 }
  0x1e   :  { %79 = vrot.lane.b32.xlu0 %v63_v1, %s189_s0  ;;  %86 = vrot.lane.b32.xlu1 %v63_v1, %s190_s19 }
  0x22   :  { %93 = vrot.lane.b32.xlu0 %v63_v1, %s191_s20  ;;  %102 = vrot.lane.b32.xlu1 %v63_v1, %s192_s21 }
  0x80   :  { %v24_v2 = vpop.permute.xlu0 %23  ;;  %v38_v3 = vpop.permute.xlu1 %37 }
  0x81   :  { %27 = vst.msk [vmem:[#allocation5] sm:$0xff] %vm26_vm0, %v24_v2 }
  0x84   :  { %v31_v4 = vpop.permute.xlu0 %30  ;;  %v45_v5 = vpop.permute.xlu1 %44 }
  0x85   :  { %34 = vst.msk [vmem:[#allocation5] sm:$0xff] %vm33_vm1, %v31_v4 }
  0x86   :  { %41 = vst.msk [vmem:[#allocation5] sm:$0xff] %vm40_vm2, %v38_v3 }
  0x87   :  { %48 = vst.msk [vmem:[#allocation5] sm:$0xff] %vm47_vm3, %v45_v5 }
  0x88   :  { %v52_v6 = vpop.permute.xlu0 %51  ;;  %v59_v7 = vpop.permute.xlu1 %58 }
  0x89   :  { %55 = vst.msk [vmem:[#allocation5] sm:$0xff] %vm54_vm4, %v52_v6 }
  0x8a   :  { %62 = vst.msk [vmem:[#allocation5] sm:$0xff] %vm61_vm5, %v59_v7 }
  0x8c   :  { %v66_v8 = vpop.permute.xlu0 %65  ;;  %v73_v9 = vpop.permute.xlu1 %72 }
  0x8d   :  { %69 = vst.msk [vmem:[#allocation5] sm:$0xff] %vm68_vm6, %v66_v8 }
  0x8e   :  { %76 = vst.msk [vmem:[#allocation5] sm:$0xff] %vm75_vm7, %v73_v9 }
  0x90   :  { %v80_v10 = vpop.permute.xlu0 %79  ;;  %v87_v11 = vpop.permute.xlu1 %86 }
  0x91   :  { %83 = vst.msk [vmem:[#allocation5] sm:$0xff] %vm82_vm8, %v80_v10 }
  0x92   :  { %90 = vst.msk [vmem:[#allocation5] sm:$0xff] %vm89_vm9, %v87_v11 }
  0x94   :  { %v94_v12 = vpop.permute.xlu0 %93  ;;  %v103_v13 = vpop.permute.xlu1 %102 }
  0x95   :  { %99 = vst.msk [vmem:[#allocation5 + $0x8] sm:$0xff] %vm98_vm10, %v94_v12 }
  0x96   :  { %97 = vst.msk [vmem:[#allocation5] sm:$0xff] %vm96_vm11, %v94_v12 }
  0x97   :  { %106 = vst.msk [vmem:[#allocation5 + $0x8] sm:$0xff] %vm105_vm12, %v103_v13 }
  0x98   :  { %167 = shalt.err (!%p164_p9)
}
  0x99   :  { %116 = dma.vmem_to_hbm [thread:$0]  %s114_s23, 256, %s211_s1, [#allocation4]  }
  0x9a   :  { %178 = dma.done.wait [#allocation4], 256  }
  0x9b   :  { %179 = vsyncadd [#allocation4], 4294967040 }
  0x9c   :  { %120 = vsyncpa [#allocation3], 1 }
  0x9d   :  { %121 = vsyncpa [#allocation4], 1 }

</bundles_post_ra>
